<compile_context>
chip_gen: v6e
topology: v6e:2x2x1
jax: 0.10.0
libtpu: 0.0.40
codegen_flags: <defaults>
</compile_context>

<pallas_src>
import jax
import jax.numpy as jnp
from jax.experimental import pallas as pl
from jax.experimental.pallas import tpu as pltpu


def _pos_embed_kernel(col_t_ref, row_t_ref, out_ref):
    """Builds the (2F, H, W) NCHW positional-embedding slab with one store.

    col_t_ref: (F, W)  col_embed(arange(W)), transposed (channel-major)
    row_t_ref: (F, H)  row_embed(arange(H)), transposed (channel-major)
    out_ref:   (2F, H, W)
    """
    F, W = col_t_ref.shape
    H = row_t_ref.shape[1]

    col_t = col_t_ref[...]  # (F, W)
    row_t = row_t_ref[...]  # (F, H)

    # channels [0, F):   pos[c, h, w] = col_emb[w, c]   (broadcast along H / sublanes)
    top = jnp.broadcast_to(col_t[:, None, :], (F, H, W))
    # channels [F, 2F):  pos[c, h, w] = row_emb[h, c]   (broadcast along W / lanes)
    bot = jnp.broadcast_to(row_t[:, :, None], (F, H, W))

    # Single full-block store; concatenation is along the leading (untiled) channel dim.
    out_ref[...] = jnp.concatenate([top, bot], axis=0)


def position_embedding_learned(x, row_weight, col_weight):
    """JAX/Pallas equivalent of PositionEmbeddingLearned.forward.

    x:          (B, C, H, W)  -- only its shape is used (as in the PyTorch module)
    row_weight: (50, F) learned row embedding table
    col_weight: (50, F) learned col embedding table
    returns:    (B, 2F, H, W) float32, matching the PyTorch NCHW output
    """
    B, _, H, W = x.shape
    F = row_weight.shape[1]

    # Embedding lookup with arange indices == slicing the first H / W rows (glue),
    # plus tiny transposes of the small tables so the kernel sees channel-major inputs.
    col_t = jnp.transpose(col_weight[:W])  # (F, W)
    row_t = jnp.transpose(row_weight[:H])  # (F, H)

    pos_chw = pl.pallas_call(
        _pos_embed_kernel,
        out_shape=jax.ShapeDtypeStruct((2 * F, H, W), jnp.float32),
        grid_spec=pltpu.PrefetchScalarGridSpec(
            num_scalar_prefetch=0,
            grid=(1,),
            in_specs=[
                pl.BlockSpec((F, W), lambda i: (0, 0)),        # col_t (full)
                pl.BlockSpec((F, H), lambda i: (0, 0)),        # row_t (full)
            ],
            out_specs=pl.BlockSpec((2 * F, H, W), lambda i: (0, 0, 0)),
        ),
        compiler_params=pltpu.CompilerParams(
            dimension_semantics=("arbitrary",),
        ),
    )(col_t, row_t)
    # TODO(synk): for very large feature maps on v7x (slab >> VMEM budget), add an H grid
    # axis so the output block is a sub-tile, and raise vmem_limit_bytes with headroom.

    # Batch "repeat" is a free broadcast: no per-batch recompute or extra kernel writes;
    # it materializes at most once if the consumer needs a dense (B, 2F, H, W) tensor.
    return jnp.broadcast_to(pos_chw[None], (B, 2 * F, H, W))


if __name__ == "__main__":
    # Small, deterministic setup.
    B, C, H, W = 2, 4, 16, 16
    NUM_POS_FEATS = 32  # num_pos_feats (PyTorch default 256; small here)

    key = jax.random.PRNGKey(0)
    k_row, k_col, k_x = jax.random.split(key, 3)

    # nn.init.uniform_ -> U[0, 1)
    row_weight = jax.random.uniform(k_row, (50, NUM_POS_FEATS), dtype=jnp.float32)
    col_weight = jax.random.uniform(k_col, (50, NUM_POS_FEATS), dtype=jnp.float32)

    x = jax.random.normal(k_x, (B, C, H, W), dtype=jnp.float32)

    pos = position_embedding_learned(x, row_weight, col_weight)
    pos = jax.block_until_ready(pos)

    # Pure-JAX reference (mirrors the PyTorch forward exactly).
    x_emb = col_weight[:W]                       # (W, F)
    y_emb = row_weight[:H]                       # (H, F)
    ref = jnp.concatenate(
        [
            jnp.broadcast_to(x_emb[None, :, :], (H, W, NUM_POS_FEATS)),
            jnp.broadcast_to(y_emb[:, None, :], (H, W, NUM_POS_FEATS)),
        ],
        axis=-1,
    )                                            # (H, W, 2F)
    ref = jnp.transpose(ref, (2, 0, 1))[None]    # (1, 2F, H, W)
    ref = jnp.broadcast_to(ref, (B, 2 * NUM_POS_FEATS, H, W))

    assert pos.shape == (B, 2 * NUM_POS_FEATS, H, W), pos.shape
    assert pos.dtype == jnp.float32
    assert jnp.allclose(pos, ref, atol=0.0, rtol=0.0), "mismatch vs reference"

    print("KERNEL_OK")
</pallas_src>

<mosaic_0001>
module attributes {stable_mosaic.version = 11 : i64} {
  func.func @_pos_embed_kernel(%arg0: i32, %arg1: memref<32x16xf32, #tpu.memory_space<vmem>>, %arg2: memref<32x16xf32, #tpu.memory_space<vmem>>, %arg3: memref<64x16x16xf32, #tpu.memory_space<vmem>>) attributes {dimension_semantics = [#tpu.dimension_semantics<arbitrary>], iteration_bounds = array<i64: 1>, scalar_prefetch = 0 : i64, scratch_operands = 0 : i64, tpu.core_type = #tpu.core_type<tc>, window_params = [{pipeline_mode = #tpu.pipeline_mode<synchronous>, transform_indices = @transform_0, window_bounds = array<i64: 32, 16>}, {pipeline_mode = #tpu.pipeline_mode<synchronous>, transform_indices = @transform_1, window_bounds = array<i64: 32, 16>}, {pipeline_mode = #tpu.pipeline_mode<synchronous>, transform_indices = @transform_2, window_bounds = array<i64: 64, 16, 16>}]} {
    %c0 = arith.constant 0 : index
    %c0_0 = arith.constant 0 : index
    %0 = vector.load %arg1[%c0, %c0_0] : memref<32x16xf32, #tpu.memory_space<vmem>>, vector<32x16xf32>
    %c0_1 = arith.constant 0 : index
    %c0_2 = arith.constant 0 : index
    %1 = vector.load %arg2[%c0_1, %c0_2] : memref<32x16xf32, #tpu.memory_space<vmem>>, vector<32x16xf32>
    %2 = vector.shape_cast %0 : vector<32x16xf32> to vector<32x1x16xf32>
    %3 = vector.shape_cast %2 : vector<32x1x16xf32> to vector<32x1x16xf32>
    %4 = vector.broadcast %3 : vector<32x1x16xf32> to vector<32x16x16xf32>
    %5 = vector.shape_cast %1 : vector<32x16xf32> to vector<32x16x1xf32>
    %6 = vector.shape_cast %5 : vector<32x16x1xf32> to vector<32x16x1xf32>
    %7 = vector.broadcast %6 : vector<32x16x1xf32> to vector<32x16x16xf32>
    %8 = tpu.concatenate %4, %7 in 0 : vector<32x16x16xf32>, vector<32x16x16xf32> -> vector<64x16x16xf32>
    %c0_3 = arith.constant 0 : index
    %c0_4 = arith.constant 0 : index
    %c0_5 = arith.constant 0 : index
    %9 = vector.load %arg3[%c0_3, %c0_4, %c0_5] : memref<64x16x16xf32, #tpu.memory_space<vmem>>, vector<64x16x16xf32>
    tpu.vector_store %arg3[%c0_3, %c0_4, %c0_5], %8 {strides = array<i32>} : memref<64x16x16xf32, #tpu.memory_space<vmem>>, vector<64x16x16xf32>,
    return
  }
  func.func @transform_0(%arg0: i32) -> (i32, i32) {
    %c0_i32 = arith.constant 0 : i32
    %c0_i32_0 = arith.constant 0 : i32
    %c0_i32_1 = arith.constant 0 : i32
    return %c0_i32, %c0_i32_0 : i32, i32
  }
  func.func @transform_1(%arg0: i32) -> (i32, i32) {
    %c0_i32 = arith.constant 0 : i32
    %c0_i32_0 = arith.constant 0 : i32
    %c0_i32_1 = arith.constant 0 : i32
    return %c0_i32, %c0_i32_0 : i32, i32
  }
  func.func @transform_2(%arg0: i32) -> (i32, i32, i32) {
    %c0_i32 = arith.constant 0 : i32
    %c0_i32_0 = arith.constant 0 : i32
    %c0_i32_1 = arith.constant 0 : i32
    %c0_i32_2 = arith.constant 0 : i32
    return %c0_i32, %c0_i32_0, %c0_i32_1 : i32, i32, i32
  }
}

</mosaic_0001>

<bundles_post_ra>
// kernel: tpu_custom_call.1
= control target key start
LH: loop header
LB: loop body
LE: loop exit
PB: predicated region body
PF: predicated region fallthrough
CT: control target
= control target key end

     0   :  { %v27_v0 = vlaneseq  ;;  %v869_v1 = vmov 1966171168   ;;  %vm731_vm0 = vcmask 130048   ;;  %s1576_s1 = inlined_call_operand.vmem [shape: f32[32,16], index: 1, kind: input, shape index: {}]   ;;  %s1577_s0 = inlined_call_operand.vmem [shape: f32[32,16], index: 0, kind: input, shape index: {}]   ;;  %s1578_s2 = inlined_call_operand.vmem [shape: f32[64,16,16], index: 2, kind: output, shape index: {}]  }
   0x1   :  { %v25_v2 = vunpack.c.l.s4 %v869_v1  ;;  %v11_v3 = vld [vmem:[%s1577_s0] sm:$0xff]  ;;  %v12_v4 = vld [vmem:[%s1577_s0 + $0x8] sm:$0xff]  ;;  %v13_v6 = vld [vmem:[%s1577_s0 + $0x10] sm:$0xff] }
   0x2   :  { %v891_v5 = vshrl.u32 %v27_v0, 7  ;;  %v14_v7 = vld [vmem:[%s1577_s0 + $0x18] sm:$0xff]  ;;  %v23_v8 = vcombine.high %v11_v3, %v11_v3  ;;  %v902_v9 = vld [vmem:[%s1576_s1] sm:$0xff]  ;;  %v72_v11 = vcombine.high %v12_v4, %v12_v4  ;;  %v121_v12 = vcombine.high %v13_v6, %v13_v6 }
   0x3   :  { %v26_v10 = vunpack.c.0.s8 %v25_v2  ;;  %v170_v13 = vcombine.high %v14_v7, %v14_v7 }
   0x4   :  { %v905_v14 = vsub.s32 0, %v891_v5  ;;  %v908_v15 = vsub.s32 1, %v891_v5  ;;  %v911_v16 = vsub.s32 2, %v891_v5  ;;  %v914_v17 = vsub.s32 3, %v891_v5 }
   0x5   :  { %v29_v18 = vsub.s32 %v26_v10, %v891_v5  ;;  %v918_v19 = vsub.s32 4, %v891_v5  ;;  %v921_v20 = vsub.s32 5, %v891_v5  ;;  %v924_v21 = vsub.s32 6, %v891_v5 }
   0x6   :  { %v393_v22 = vrot.slane %v902_v9, %v908_v15  ;;  %v382_v23 = vrot.slane %v902_v9, %v905_v14  ;;  %v404_v24 = vrot.slane %v902_v9, %v911_v16  ;;  %v934_v25 = vrot.slane %v902_v9, %v914_v17 }
   0x7   :  { %v30_v26 = vrot.slane %v11_v3, %v29_v18  ;;  %v37_v27 = vrot.slane %v23_v8, %v29_v18  ;;  %v79_v28 = vrot.slane %v12_v4, %v29_v18  ;;  %v86_v29 = vrot.slane %v72_v11, %v29_v18 }
   0x8   :  { %395 = vbcast.lane.b32.xlu1 %v393_v22, 256  ;;  %v128_v30 = vrot.slane %v13_v6, %v29_v18  ;;  %v135_v31 = vrot.slane %v121_v12, %v29_v18  ;;  %v177_v32 = vrot.slane %v14_v7, %v29_v18  ;;  %v184_v33 = vrot.slane %v170_v13, %v29_v18 }
   0x9   :  { %v38_v34 = vcombine.high %v30_v26, %v30_v26  ;;  %v39_v35 = vcombine.high %v37_v27, %v37_v27  ;;  %v46_v36 = vrot.slane %v30_v26, %v29_v18  ;;  %v53_v37 = vrot.slane %v37_v27, %v29_v18  ;;  %384 = vbcast.lane.b32.xlu0 %v382_v23, 256 }
   0xa   :  { %v87_v38 = vcombine.high %v79_v28, %v79_v28  ;;  %v88_v39 = vcombine.high %v86_v29, %v86_v29  ;;  %v95_v40 = vrot.slane %v79_v28, %v29_v18  ;;  %v936_v41 = vrot.slane %v86_v29, %v29_v18 }
   0xb   :  { %v60_v42 = vrot.slane %v38_v34, %v29_v18  ;;  %v67_v43 = vrot.slane %v39_v35, %v29_v18  ;;  %v68_v44 = vcombine.high %v46_v36, %v46_v36  ;;  %v69_v45 = vcombine.high %v53_v37, %v53_v37 }
   0xc   :  { %v109_v46 = vrot.slane %v87_v38, %v29_v18  ;;  %v116_v47 = vrot.slane %v88_v39, %v29_v18  ;;  %v117_v48 = vcombine.high %v95_v40, %v95_v40  ;;  %v118_v49 = vcombine.high %v936_v41, %v936_v41  ;;  %399 = vbcast.lane.b32.xlu1 %v393_v22, 264 }
   0xd   :  { %v70_v50 = vcombine.high %v60_v42, %v60_v42  ;;  %v71_v51 = vcombine.high %v67_v43, %v67_v43  ;;  %v136_v52 = vcombine.high %v128_v30, %v128_v30  ;;  %v137_v53 = vcombine.high %v135_v31, %v135_v31  ;;  %388 = vbcast.lane.b32.xlu0 %v382_v23, 264 }
   0xe   :  { %v119_v54 = vcombine.high %v109_v46, %v109_v46  ;;  %v120_v55 = vcombine.high %v116_v47, %v116_v47  ;;  %v144_v56 = vrot.slane %v128_v30, %v29_v18  ;;  %v940_v57 = vrot.slane %v135_v31, %v29_v18 }
   0xf   :  { %v158_v58 = vrot.slane %v136_v52, %v29_v18  ;;  %v942_v59 = vrot.slane %v137_v53, %v29_v18  ;;  %v185_v60 = vcombine.high %v177_v32, %v177_v32  ;;  %v186_v61 = vcombine.high %v184_v33, %v184_v33  ;;  %v17_v52 = vld [vmem:[%s1576_s1 + $0x10] sm:$0xff] }
  0x10   :  { %v166_v62 = vcombine.high %v144_v56, %v144_v56  ;;  %v167_v63 = vcombine.high %v940_v57, %v940_v57  ;;  %v946_v0 = vrot.slane %v177_v32, %v29_v18  ;;  %v948_v1 = vrot.slane %v184_v33, %v29_v18  ;;  %410 = vbcast.lane.b32.xlu1 %v404_v24, 264 }
  0x11   :  { %v168_v2 = vcombine.high %v158_v58, %v158_v58  ;;  %v169_v3 = vcombine.high %v942_v59, %v942_v59  ;;  %v952_v4 = vrot.slane %v185_v60, %v29_v18  ;;  %v954_v6 = vrot.slane %v186_v61, %v29_v18  ;;  %406 = vbcast.lane.b32.xlu0 %v404_v24, 256 }
  0x12   :  { %v215_v7 = vcombine.high %v946_v0, %v946_v0  ;;  %v216_v8 = vcombine.high %v948_v1, %v948_v1  ;;  %v222_v10 = vrot.slane %v46_v36, %v905_v14  ;;  %v226_v11 = vrot.slane %v60_v42, %v905_v14 }
  0x13   :  { %v217_v12 = vcombine.high %v952_v4, %v952_v4  ;;  %v218_v13 = vcombine.high %v954_v6, %v954_v6  ;;  %v230_v18 = vrot.slane %v68_v44, %v905_v14  ;;  %v234_v22 = vrot.slane %v70_v50, %v905_v14 }
  0x14   :  { %v238_v23 = vrot.slane %v53_v37, %v905_v14  ;;  %v242_v24 = vrot.slane %v67_v43, %v905_v14  ;;  %v246_v26 = vrot.slane %v69_v45, %v905_v14  ;;  %v250_v27 = vrot.slane %v71_v51, %v905_v14  ;;  %732 = vst.msk [vmem:[%s1578_s2] sm:$0xff] %vm731_vm0, %v222_v10 }
  0x15   :  { %733 = vst.msk [vmem:[%s1578_s2 + $0x8] sm:$0xff] %vm731_vm0, %v222_v10  ;;  %734 = vst.msk [vmem:[%s1578_s2 + $0x10] sm:$0xff] %vm731_vm0, %v226_v11  ;;  %421 = vbcast.lane.b32.xlu1 %v934_v25, 264  ;;  %v254_v28 = vrot.slane %v95_v40, %v905_v14  ;;  %v258_v29 = vrot.slane %v109_v46, %v905_v14  ;;  %v262_v30 = vrot.slane %v117_v48, %v905_v14 }
  0x16   :  { %735 = vst.msk [vmem:[%s1578_s2 + $0x18] sm:$0xff] %vm731_vm0, %v226_v11  ;;  %v266_v31 = vrot.slane %v119_v54, %v905_v14  ;;  %736 = vst.msk [vmem:[%s1578_s2 + $0x20] sm:$0xff] %vm731_vm0, %v230_v18  ;;  %417 = vbcast.lane.b32.xlu0 %v934_v25, 256  ;;  %v270_v32 = vrot.slane %v936_v41, %v905_v14  ;;  %v274_v33 = vrot.slane %v116_v47, %v905_v14  ;;  %v18_v54 = vld [vmem:[%s1576_s1 + $0x18] sm:$0xff]  ;;  %v16_v11 = vld [vmem:[%s1576_s1 + $0x8] sm:$0xff] }
  0x17   :  { %737 = vst.msk [vmem:[%s1578_s2 + $0x28] sm:$0xff] %vm731_vm0, %v230_v18  ;;  %738 = vst.msk [vmem:[%s1578_s2 + $0x30] sm:$0xff] %vm731_vm0, %v234_v22  ;;  %v278_v34 = vrot.slane %v118_v49, %v905_v14  ;;  %v282_v35 = vrot.slane %v120_v55, %v905_v14  ;;  %v286_v25 = vrot.slane %v144_v56, %v905_v14  ;;  %v458_v56 = vsub.s32 7, %v891_v5 }
  0x18   :  { %739 = vst.msk [vmem:[%s1578_s2 + $0x38] sm:$0xff] %vm731_vm0, %v234_v22  ;;  %740 = vst.msk [vmem:[%s1578_s2 + $0x40] sm:$0xff] %vm731_vm0, %v238_v23  ;;  %v290_v36 = vrot.slane %v158_v58, %v905_v14  ;;  %v294_v37 = vrot.slane %v166_v62, %v905_v14  ;;  %v298_v38 = vrot.slane %v168_v2, %v905_v14 }
  0x19   :  { %741 = vst.msk [vmem:[%s1578_s2 + $0x48] sm:$0xff] %vm731_vm0, %v238_v23  ;;  %742 = vst.msk [vmem:[%s1578_s2 + $0x50] sm:$0xff] %vm731_vm0, %v242_v24  ;;  %v302_v39 = vrot.slane %v940_v57, %v905_v14  ;;  %v306_v40 = vrot.slane %v942_v59, %v905_v14  ;;  %v310_v41 = vrot.slane %v167_v63, %v905_v14 }
  0x1a   :  { %743 = vst.msk [vmem:[%s1578_s2 + $0x58] sm:$0xff] %vm731_vm0, %v242_v24  ;;  %744 = vst.msk [vmem:[%s1578_s2 + $0x60] sm:$0xff] %vm731_vm0, %v246_v26  ;;  %v314_v42 = vrot.slane %v169_v3, %v905_v14  ;;  %v318_v43 = vrot.slane %v946_v0, %v905_v14  ;;  %v322_v44 = vrot.slane %v952_v4, %v905_v14 }
  0x1b   :  { %745 = vst.msk [vmem:[%s1578_s2 + $0x68] sm:$0xff] %vm731_vm0, %v246_v26  ;;  %746 = vst.msk [vmem:[%s1578_s2 + $0x70] sm:$0xff] %vm731_vm0, %v250_v27  ;;  %v326_v45 = vrot.slane %v215_v7, %v905_v14  ;;  %v330_v46 = vrot.slane %v217_v12, %v905_v14  ;;  %v334_v47 = vrot.slane %v948_v1, %v905_v14 }
  0x1c   :  { %747 = vst.msk [vmem:[%s1578_s2 + $0x78] sm:$0xff] %vm731_vm0, %v250_v27  ;;  %748 = vst.msk [vmem:[%s1578_s2 + $0x80] sm:$0xff] %vm731_vm0, %v254_v28  ;;  %v338_v48 = vrot.slane %v954_v6, %v905_v14  ;;  %v342_v49 = vrot.slane %v216_v8, %v905_v14  ;;  %v346_v50 = vrot.slane %v218_v13, %v905_v14 }
  0x1d   :  { %749 = vst.msk [vmem:[%s1578_s2 + $0x88] sm:$0xff] %vm731_vm0, %v254_v28  ;;  %750 = vst.msk [vmem:[%s1578_s2 + $0x90] sm:$0xff] %vm731_vm0, %v258_v29  ;;  %v426_v51 = vrot.slane %v902_v9, %v918_v19  ;;  %v437_v53 = vrot.slane %v902_v9, %v921_v20  ;;  %v448_v55 = vrot.slane %v902_v9, %v924_v21 }
  0x1e   :  { %751 = vst.msk [vmem:[%s1578_s2 + $0x98] sm:$0xff] %vm731_vm0, %v258_v29  ;;  %752 = vst.msk [vmem:[%s1578_s2 + $0xa0] sm:$0xff] %vm731_vm0, %v262_v30  ;;  %v558_v57 = vrot.slane %v17_v52, %v905_v14  ;;  %v569_v58 = vrot.slane %v17_v52, %v908_v15  ;;  %v580_v59 = vrot.slane %v17_v52, %v911_v16 }
  0x1f   :  { %753 = vst.msk [vmem:[%s1578_s2 + $0xa8] sm:$0xff] %vm731_vm0, %v262_v30  ;;  %754 = vst.msk [vmem:[%s1578_s2 + $0xb0] sm:$0xff] %vm731_vm0, %v266_v31  ;;  %432 = vbcast.lane.b32.xlu1 %v426_v51, 264  ;;  %428 = vbcast.lane.b32.xlu0 %v426_v51, 256  ;;  %v591_v60 = vrot.slane %v17_v52, %v914_v17  ;;  %v602_v61 = vrot.slane %v17_v52, %v918_v19 }
  0x20   :  { %755 = vst.msk [vmem:[%s1578_s2 + $0xb8] sm:$0xff] %vm731_vm0, %v266_v31  ;;  %756 = vst.msk [vmem:[%s1578_s2 + $0xc0] sm:$0xff] %vm731_vm0, %v270_v32  ;;  %v613_v62 = vrot.slane %v17_v52, %v921_v20  ;;  %v624_v63 = vrot.slane %v17_v52, %v924_v21  ;;  %v635_v0 = vrot.slane %v17_v52, %v458_v56 }
  0x21   :  { %757 = vst.msk [vmem:[%s1578_s2 + $0xc8] sm:$0xff] %vm731_vm0, %v270_v32  ;;  %758 = vst.msk [vmem:[%s1578_s2 + $0xd0] sm:$0xff] %vm731_vm0, %v274_v33  ;;  %v646_v1 = vrot.slane %v18_v54, %v905_v14  ;;  %v657_v2 = vrot.slane %v18_v54, %v908_v15  ;;  %v668_v5 = vrot.slane %v18_v54, %v911_v16 }
  0x22   :  { %759 = vst.msk [vmem:[%s1578_s2 + $0xd8] sm:$0xff] %vm731_vm0, %v274_v33  ;;  %760 = vst.msk [vmem:[%s1578_s2 + $0xe0] sm:$0xff] %vm731_vm0, %v278_v34  ;;  %v679_v3 = vrot.slane %v18_v54, %v914_v17  ;;  %v690_v4 = vrot.slane %v18_v54, %v918_v19  ;;  %v1296_v6 = vrot.slane %v18_v54, %v921_v20 }
  0x23   :  { %761 = vst.msk [vmem:[%s1578_s2 + $0xe8] sm:$0xff] %vm731_vm0, %v278_v34  ;;  %762 = vst.msk [vmem:[%s1578_s2 + $0xf0] sm:$0xff] %vm731_vm0, %v282_v35  ;;  %443 = vbcast.lane.b32.xlu1 %v437_v53, 264  ;;  %439 = vbcast.lane.b32.xlu0 %v437_v53, 256  ;;  %v1299_v7 = vrot.slane %v18_v54, %v924_v21  ;;  %v1301_v8 = vrot.slane %v18_v54, %v458_v56 }
  0x24   :  { %763 = vst.msk [vmem:[%s1578_s2 + $0xf8] sm:$0xff] %vm731_vm0, %v282_v35  ;;  %764 = vst.msk [vmem:[%s1578_s2 + $0x100] sm:$0xff] %vm731_vm0, %v286_v25  ;;  %v459_v10 = vrot.slane %v902_v9, %v458_v56  ;;  %v470_v12 = vrot.slane %v16_v11, %v905_v14  ;;  %v481_v13 = vrot.slane %v16_v11, %v908_v15 }
  0x25   :  { %765 = vst.msk [vmem:[%s1578_s2 + $0x108] sm:$0xff] %vm731_vm0, %v286_v25  ;;  %766 = vst.msk [vmem:[%s1578_s2 + $0x110] sm:$0xff] %vm731_vm0, %v290_v36  ;;  %v492_v18 = vrot.slane %v16_v11, %v911_v16  ;;  %v503_v9 = vrot.slane %v16_v11, %v914_v17  ;;  %v514_v22 = vrot.slane %v16_v11, %v918_v19 }
  0x26   :  { %767 = vst.msk [vmem:[%s1578_s2 + $0x118] sm:$0xff] %vm731_vm0, %v290_v36  ;;  %768 = vst.msk [vmem:[%s1578_s2 + $0x120] sm:$0xff] %vm731_vm0, %v294_v37  ;;  %v525_v14 = vrot.slane %v16_v11, %v921_v20  ;;  %v536_v15 = vrot.slane %v16_v11, %v924_v21  ;;  %v547_v23 = vrot.slane %v16_v11, %v458_v56 }
  0x27   :  { %769 = vst.msk [vmem:[%s1578_s2 + $0x128] sm:$0xff] %vm731_vm0, %v294_v37  ;;  %770 = vst.msk [vmem:[%s1578_s2 + $0x130] sm:$0xff] %vm731_vm0, %v298_v38  ;;  %454 = vbcast.lane.b32.xlu1 %v448_v55, 264  ;;  %450 = vbcast.lane.b32.xlu0 %v448_v55, 256 }
  0x28   :  { %771 = vst.msk [vmem:[%s1578_s2 + $0x138] sm:$0xff] %vm731_vm0, %v298_v38  ;;  %772 = vst.msk [vmem:[%s1578_s2 + $0x140] sm:$0xff] %vm731_vm0, %v302_v39 }
  0x29   :  { %773 = vst.msk [vmem:[%s1578_s2 + $0x148] sm:$0xff] %vm731_vm0, %v302_v39  ;;  %774 = vst.msk [vmem:[%s1578_s2 + $0x150] sm:$0xff] %vm731_vm0, %v306_v40 }
  0x2a   :  { %775 = vst.msk [vmem:[%s1578_s2 + $0x158] sm:$0xff] %vm731_vm0, %v306_v40  ;;  %776 = vst.msk [vmem:[%s1578_s2 + $0x160] sm:$0xff] %vm731_vm0, %v310_v41 }
  0x2b   :  { %777 = vst.msk [vmem:[%s1578_s2 + $0x168] sm:$0xff] %vm731_vm0, %v310_v41  ;;  %778 = vst.msk [vmem:[%s1578_s2 + $0x170] sm:$0xff] %vm731_vm0, %v314_v42  ;;  %465 = vbcast.lane.b32.xlu1 %v459_v10, 264  ;;  %461 = vbcast.lane.b32.xlu0 %v459_v10, 256 }
  0x2c   :  { %779 = vst.msk [vmem:[%s1578_s2 + $0x178] sm:$0xff] %vm731_vm0, %v314_v42  ;;  %780 = vst.msk [vmem:[%s1578_s2 + $0x180] sm:$0xff] %vm731_vm0, %v318_v43 }
  0x2d   :  { %781 = vst.msk [vmem:[%s1578_s2 + $0x188] sm:$0xff] %vm731_vm0, %v318_v43  ;;  %782 = vst.msk [vmem:[%s1578_s2 + $0x190] sm:$0xff] %vm731_vm0, %v322_v44 }
  0x2e   :  { %783 = vst.msk [vmem:[%s1578_s2 + $0x198] sm:$0xff] %vm731_vm0, %v322_v44  ;;  %784 = vst.msk [vmem:[%s1578_s2 + $0x1a0] sm:$0xff] %vm731_vm0, %v326_v45 }
  0x2f   :  { %785 = vst.msk [vmem:[%s1578_s2 + $0x1a8] sm:$0xff] %vm731_vm0, %v326_v45  ;;  %786 = vst.msk [vmem:[%s1578_s2 + $0x1b0] sm:$0xff] %vm731_vm0, %v330_v46  ;;  %476 = vbcast.lane.b32.xlu1 %v470_v12, 264  ;;  %472 = vbcast.lane.b32.xlu0 %v470_v12, 256 }
  0x30   :  { %787 = vst.msk [vmem:[%s1578_s2 + $0x1b8] sm:$0xff] %vm731_vm0, %v330_v46  ;;  %788 = vst.msk [vmem:[%s1578_s2 + $0x1c0] sm:$0xff] %vm731_vm0, %v334_v47 }
  0x31   :  { %789 = vst.msk [vmem:[%s1578_s2 + $0x1c8] sm:$0xff] %vm731_vm0, %v334_v47  ;;  %790 = vst.msk [vmem:[%s1578_s2 + $0x1d0] sm:$0xff] %vm731_vm0, %v338_v48 }
  0x32   :  { %791 = vst.msk [vmem:[%s1578_s2 + $0x1d8] sm:$0xff] %vm731_vm0, %v338_v48  ;;  %792 = vst.msk [vmem:[%s1578_s2 + $0x1e0] sm:$0xff] %vm731_vm0, %v342_v49 }
  0x33   :  { %793 = vst.msk [vmem:[%s1578_s2 + $0x1e8] sm:$0xff] %vm731_vm0, %v342_v49  ;;  %794 = vst.msk [vmem:[%s1578_s2 + $0x1f0] sm:$0xff] %vm731_vm0, %v346_v50  ;;  %487 = vbcast.lane.b32.xlu1 %v481_v13, 264  ;;  %483 = vbcast.lane.b32.xlu0 %v481_v13, 256 }
  0x34   :  { %795 = vst.msk [vmem:[%s1578_s2 + $0x1f8] sm:$0xff] %vm731_vm0, %v346_v50 }
  0x37   :  { %498 = vbcast.lane.b32.xlu1 %v492_v18, 264  ;;  %494 = vbcast.lane.b32.xlu0 %v492_v18, 256 }
  0x3b   :  { %509 = vbcast.lane.b32.xlu1 %v503_v9, 264  ;;  %505 = vbcast.lane.b32.xlu0 %v503_v9, 256 }
  0x3f   :  { %520 = vbcast.lane.b32.xlu1 %v514_v22, 264  ;;  %516 = vbcast.lane.b32.xlu0 %v514_v22, 256 }
  0x43   :  { %531 = vbcast.lane.b32.xlu1 %v525_v14, 264  ;;  %527 = vbcast.lane.b32.xlu0 %v525_v14, 256 }
  0x47   :  { %542 = vbcast.lane.b32.xlu1 %v536_v15, 264  ;;  %538 = vbcast.lane.b32.xlu0 %v536_v15, 256 }
  0x4b   :  { %553 = vbcast.lane.b32.xlu1 %v547_v23, 264  ;;  %549 = vbcast.lane.b32.xlu0 %v547_v23, 256 }
  0x4f   :  { %564 = vbcast.lane.b32.xlu1 %v558_v57, 264  ;;  %560 = vbcast.lane.b32.xlu0 %v558_v57, 256 }
  0x53   :  { %575 = vbcast.lane.b32.xlu1 %v569_v58, 264  ;;  %571 = vbcast.lane.b32.xlu0 %v569_v58, 256 }
  0x57   :  { %586 = vbcast.lane.b32.xlu1 %v580_v59, 264  ;;  %582 = vbcast.lane.b32.xlu0 %v580_v59, 256 }
  0x5b   :  { %597 = vbcast.lane.b32.xlu1 %v591_v60, 264  ;;  %593 = vbcast.lane.b32.xlu0 %v591_v60, 256 }
  0x5f   :  { %608 = vbcast.lane.b32.xlu1 %v602_v61, 264  ;;  %604 = vbcast.lane.b32.xlu0 %v602_v61, 256 }
  0x63   :  { %619 = vbcast.lane.b32.xlu1 %v613_v62, 264  ;;  %615 = vbcast.lane.b32.xlu0 %v613_v62, 256 }
  0x67   :  { %630 = vbcast.lane.b32.xlu1 %v624_v63, 264  ;;  %626 = vbcast.lane.b32.xlu0 %v624_v63, 256 }
  0x6b   :  { %641 = vbcast.lane.b32.xlu1 %v635_v0, 264  ;;  %637 = vbcast.lane.b32.xlu0 %v635_v0, 256 }
  0x6f   :  { %652 = vbcast.lane.b32.xlu1 %v646_v1, 264  ;;  %648 = vbcast.lane.b32.xlu0 %v646_v1, 256 }
  0x73   :  { %663 = vbcast.lane.b32.xlu1 %v657_v2, 264  ;;  %659 = vbcast.lane.b32.xlu0 %v657_v2, 256 }
  0x77   :  { %674 = vbcast.lane.b32.xlu1 %v668_v5, 264  ;;  %670 = vbcast.lane.b32.xlu0 %v668_v5, 256 }
  0x7a   :  { %v396_v16 = vpop.permute.xlu1 %395 }
  0x7b   :  { %685 = vbcast.lane.b32.xlu1 %v679_v3, 264  ;;  %681 = vbcast.lane.b32.xlu0 %v679_v3, 256  ;;  %798 = vst.msk [vmem:[%s1578_s2 + $0x210] sm:$0xff] %vm731_vm0, %v396_v16  ;;  %v385_v17 = vpop.permute.xlu0 %384 }
  0x7c   :  { %796 = vst.msk [vmem:[%s1578_s2 + $0x200] sm:$0xff] %vm731_vm0, %v385_v17 }
  0x7e   :  { %v400_v19 = vpop.permute.xlu1 %399 }
  0x7f   :  { %696 = vbcast.lane.b32.xlu1 %v690_v4, 264  ;;  %692 = vbcast.lane.b32.xlu0 %v690_v4, 256  ;;  %799 = vst.msk [vmem:[%s1578_s2 + $0x218] sm:$0xff] %vm731_vm0, %v400_v19  ;;  %v389_v20 = vpop.permute.xlu0 %388 }
  0x80   :  { %797 = vst.msk [vmem:[%s1578_s2 + $0x208] sm:$0xff] %vm731_vm0, %v389_v20 }
  0x82   :  { %v411_v21 = vpop.permute.xlu1 %410 }
  0x83   :  { %707 = vbcast.lane.b32.xlu1 %v1296_v6, 264  ;;  %703 = vbcast.lane.b32.xlu0 %v1296_v6, 256  ;;  %801 = vst.msk [vmem:[%s1578_s2 + $0x228] sm:$0xff] %vm731_vm0, %v411_v21  ;;  %v407_v24 = vpop.permute.xlu0 %406 }
  0x84   :  { %800 = vst.msk [vmem:[%s1578_s2 + $0x220] sm:$0xff] %vm731_vm0, %v407_v24 }
  0x87   :  { %718 = vbcast.lane.b32.xlu1 %v1299_v7, 264  ;;  %714 = vbcast.lane.b32.xlu0 %v1299_v7, 256  ;;  %v422_v26 = vpop.permute.xlu1 %421 }
  0x88   :  { %803 = vst.msk [vmem:[%s1578_s2 + $0x238] sm:$0xff] %vm731_vm0, %v422_v26  ;;  %v418_v27 = vpop.permute.xlu0 %417 }
  0x89   :  { %802 = vst.msk [vmem:[%s1578_s2 + $0x230] sm:$0xff] %vm731_vm0, %v418_v27 }
  0x8b   :  { %729 = vbcast.lane.b32.xlu1 %v1301_v8, 264  ;;  %725 = vbcast.lane.b32.xlu0 %v1301_v8, 256 }
  0x91   :  { %v433_v28 = vpop.permute.xlu1 %432  ;;  %v429_v29 = vpop.permute.xlu0 %428 }
  0x92   :  { %805 = vst.msk [vmem:[%s1578_s2 + $0x248] sm:$0xff] %vm731_vm0, %v433_v28  ;;  %804 = vst.msk [vmem:[%s1578_s2 + $0x240] sm:$0xff] %vm731_vm0, %v429_v29 }
  0x95   :  { %v444_v30 = vpop.permute.xlu1 %443  ;;  %v440_v31 = vpop.permute.xlu0 %439 }
  0x96   :  { %807 = vst.msk [vmem:[%s1578_s2 + $0x258] sm:$0xff] %vm731_vm0, %v444_v30  ;;  %806 = vst.msk [vmem:[%s1578_s2 + $0x250] sm:$0xff] %vm731_vm0, %v440_v31 }
  0x99   :  { %v455_v32 = vpop.permute.xlu1 %454  ;;  %v451_v33 = vpop.permute.xlu0 %450 }
  0x9a   :  { %809 = vst.msk [vmem:[%s1578_s2 + $0x268] sm:$0xff] %vm731_vm0, %v455_v32  ;;  %808 = vst.msk [vmem:[%s1578_s2 + $0x260] sm:$0xff] %vm731_vm0, %v451_v33 }
  0x9d   :  { %v466_v34 = vpop.permute.xlu1 %465  ;;  %v462_v35 = vpop.permute.xlu0 %461 }
  0x9e   :  { %811 = vst.msk [vmem:[%s1578_s2 + $0x278] sm:$0xff] %vm731_vm0, %v466_v34  ;;  %810 = vst.msk [vmem:[%s1578_s2 + $0x270] sm:$0xff] %vm731_vm0, %v462_v35 }
  0xa1   :  { %v477_v25 = vpop.permute.xlu1 %476  ;;  %v473_v36 = vpop.permute.xlu0 %472 }
  0xa2   :  { %813 = vst.msk [vmem:[%s1578_s2 + $0x288] sm:$0xff] %vm731_vm0, %v477_v25  ;;  %812 = vst.msk [vmem:[%s1578_s2 + $0x280] sm:$0xff] %vm731_vm0, %v473_v36 }
  0xa5   :  { %v488_v37 = vpop.permute.xlu1 %487  ;;  %v484_v38 = vpop.permute.xlu0 %483 }
  0xa6   :  { %815 = vst.msk [vmem:[%s1578_s2 + $0x298] sm:$0xff] %vm731_vm0, %v488_v37  ;;  %814 = vst.msk [vmem:[%s1578_s2 + $0x290] sm:$0xff] %vm731_vm0, %v484_v38 }
  0xa9   :  { %v499_v39 = vpop.permute.xlu1 %498  ;;  %v495_v40 = vpop.permute.xlu0 %494 }
  0xaa   :  { %817 = vst.msk [vmem:[%s1578_s2 + $0x2a8] sm:$0xff] %vm731_vm0, %v499_v39  ;;  %816 = vst.msk [vmem:[%s1578_s2 + $0x2a0] sm:$0xff] %vm731_vm0, %v495_v40 }
  0xad   :  { %v510_v41 = vpop.permute.xlu1 %509  ;;  %v506_v42 = vpop.permute.xlu0 %505 }
  0xae   :  { %819 = vst.msk [vmem:[%s1578_s2 + $0x2b8] sm:$0xff] %vm731_vm0, %v510_v41  ;;  %818 = vst.msk [vmem:[%s1578_s2 + $0x2b0] sm:$0xff] %vm731_vm0, %v506_v42 }
  0xb1   :  { %v521_v43 = vpop.permute.xlu1 %520  ;;  %v517_v44 = vpop.permute.xlu0 %516 }
  0xb2   :  { %821 = vst.msk [vmem:[%s1578_s2 + $0x2c8] sm:$0xff] %vm731_vm0, %v521_v43  ;;  %820 = vst.msk [vmem:[%s1578_s2 + $0x2c0] sm:$0xff] %vm731_vm0, %v517_v44 }
  0xb5   :  { %v532_v45 = vpop.permute.xlu1 %531  ;;  %v528_v46 = vpop.permute.xlu0 %527 }
  0xb6   :  { %823 = vst.msk [vmem:[%s1578_s2 + $0x2d8] sm:$0xff] %vm731_vm0, %v532_v45  ;;  %822 = vst.msk [vmem:[%s1578_s2 + $0x2d0] sm:$0xff] %vm731_vm0, %v528_v46 }
  0xb9   :  { %v543_v47 = vpop.permute.xlu1 %542  ;;  %v539_v48 = vpop.permute.xlu0 %538 }
  0xba   :  { %825 = vst.msk [vmem:[%s1578_s2 + $0x2e8] sm:$0xff] %vm731_vm0, %v543_v47  ;;  %824 = vst.msk [vmem:[%s1578_s2 + $0x2e0] sm:$0xff] %vm731_vm0, %v539_v48 }
  0xbd   :  { %v554_v49 = vpop.permute.xlu1 %553  ;;  %v550_v50 = vpop.permute.xlu0 %549 }
  0xbe   :  { %827 = vst.msk [vmem:[%s1578_s2 + $0x2f8] sm:$0xff] %vm731_vm0, %v554_v49  ;;  %826 = vst.msk [vmem:[%s1578_s2 + $0x2f0] sm:$0xff] %vm731_vm0, %v550_v50 }
  0xc1   :  { %v565_v51 = vpop.permute.xlu1 %564  ;;  %v561_v52 = vpop.permute.xlu0 %560 }
  0xc2   :  { %829 = vst.msk [vmem:[%s1578_s2 + $0x308] sm:$0xff] %vm731_vm0, %v565_v51  ;;  %828 = vst.msk [vmem:[%s1578_s2 + $0x300] sm:$0xff] %vm731_vm0, %v561_v52 }
  0xc5   :  { %v576_v53 = vpop.permute.xlu1 %575  ;;  %v572_v54 = vpop.permute.xlu0 %571 }
  0xc6   :  { %831 = vst.msk [vmem:[%s1578_s2 + $0x318] sm:$0xff] %vm731_vm0, %v576_v53  ;;  %830 = vst.msk [vmem:[%s1578_s2 + $0x310] sm:$0xff] %vm731_vm0, %v572_v54 }
  0xc9   :  { %v587_v55 = vpop.permute.xlu1 %586  ;;  %v583_v56 = vpop.permute.xlu0 %582 }
  0xca   :  { %833 = vst.msk [vmem:[%s1578_s2 + $0x328] sm:$0xff] %vm731_vm0, %v587_v55  ;;  %832 = vst.msk [vmem:[%s1578_s2 + $0x320] sm:$0xff] %vm731_vm0, %v583_v56 }
  0xcd   :  { %v598_v57 = vpop.permute.xlu1 %597  ;;  %v594_v58 = vpop.permute.xlu0 %593 }
  0xce   :  { %835 = vst.msk [vmem:[%s1578_s2 + $0x338] sm:$0xff] %vm731_vm0, %v598_v57  ;;  %834 = vst.msk [vmem:[%s1578_s2 + $0x330] sm:$0xff] %vm731_vm0, %v594_v58 }
  0xd1   :  { %v609_v59 = vpop.permute.xlu1 %608  ;;  %v605_v60 = vpop.permute.xlu0 %604 }
  0xd2   :  { %837 = vst.msk [vmem:[%s1578_s2 + $0x348] sm:$0xff] %vm731_vm0, %v609_v59  ;;  %836 = vst.msk [vmem:[%s1578_s2 + $0x340] sm:$0xff] %vm731_vm0, %v605_v60 }
  0xd5   :  { %v620_v61 = vpop.permute.xlu1 %619  ;;  %v616_v62 = vpop.permute.xlu0 %615 }
  0xd6   :  { %839 = vst.msk [vmem:[%s1578_s2 + $0x358] sm:$0xff] %vm731_vm0, %v620_v61  ;;  %838 = vst.msk [vmem:[%s1578_s2 + $0x350] sm:$0xff] %vm731_vm0, %v616_v62 }
  0xd9   :  { %v631_v63 = vpop.permute.xlu1 %630  ;;  %v627_v0 = vpop.permute.xlu0 %626 }
  0xda   :  { %841 = vst.msk [vmem:[%s1578_s2 + $0x368] sm:$0xff] %vm731_vm0, %v631_v63  ;;  %840 = vst.msk [vmem:[%s1578_s2 + $0x360] sm:$0xff] %vm731_vm0, %v627_v0 }
  0xdd   :  { %v642_v1 = vpop.permute.xlu1 %641  ;;  %v638_v2 = vpop.permute.xlu0 %637 }
  0xde   :  { %843 = vst.msk [vmem:[%s1578_s2 + $0x378] sm:$0xff] %vm731_vm0, %v642_v1  ;;  %842 = vst.msk [vmem:[%s1578_s2 + $0x370] sm:$0xff] %vm731_vm0, %v638_v2 }
  0xe1   :  { %v653_v5 = vpop.permute.xlu1 %652  ;;  %v649_v3 = vpop.permute.xlu0 %648 }
  0xe2   :  { %845 = vst.msk [vmem:[%s1578_s2 + $0x388] sm:$0xff] %vm731_vm0, %v653_v5  ;;  %844 = vst.msk [vmem:[%s1578_s2 + $0x380] sm:$0xff] %vm731_vm0, %v649_v3 }
  0xe5   :  { %v664_v4 = vpop.permute.xlu1 %663  ;;  %v660_v6 = vpop.permute.xlu0 %659 }
  0xe6   :  { %847 = vst.msk [vmem:[%s1578_s2 + $0x398] sm:$0xff] %vm731_vm0, %v664_v4  ;;  %846 = vst.msk [vmem:[%s1578_s2 + $0x390] sm:$0xff] %vm731_vm0, %v660_v6 }
  0xe9   :  { %v675_v7 = vpop.permute.xlu1 %674  ;;  %v671_v8 = vpop.permute.xlu0 %670 }
  0xea   :  { %849 = vst.msk [vmem:[%s1578_s2 + $0x3a8] sm:$0xff] %vm731_vm0, %v675_v7  ;;  %848 = vst.msk [vmem:[%s1578_s2 + $0x3a0] sm:$0xff] %vm731_vm0, %v671_v8 }
  0xed   :  { %v686_v10 = vpop.permute.xlu1 %685  ;;  %v682_v11 = vpop.permute.xlu0 %681 }
  0xee   :  { %851 = vst.msk [vmem:[%s1578_s2 + $0x3b8] sm:$0xff] %vm731_vm0, %v686_v10  ;;  %850 = vst.msk [vmem:[%s1578_s2 + $0x3b0] sm:$0xff] %vm731_vm0, %v682_v11 }
  0xf1   :  { %v697_v12 = vpop.permute.xlu1 %696  ;;  %v693_v13 = vpop.permute.xlu0 %692 }
  0xf2   :  { %853 = vst.msk [vmem:[%s1578_s2 + $0x3c8] sm:$0xff] %vm731_vm0, %v697_v12  ;;  %852 = vst.msk [vmem:[%s1578_s2 + $0x3c0] sm:$0xff] %vm731_vm0, %v693_v13 }
  0xf5   :  { %v708_v18 = vpop.permute.xlu1 %707  ;;  %v704_v9 = vpop.permute.xlu0 %703 }
  0xf6   :  { %855 = vst.msk [vmem:[%s1578_s2 + $0x3d8] sm:$0xff] %vm731_vm0, %v708_v18  ;;  %854 = vst.msk [vmem:[%s1578_s2 + $0x3d0] sm:$0xff] %vm731_vm0, %v704_v9 }
  0xf9   :  { %v719_v22 = vpop.permute.xlu1 %718  ;;  %v715_v14 = vpop.permute.xlu0 %714 }
  0xfa   :  { %857 = vst.msk [vmem:[%s1578_s2 + $0x3e8] sm:$0xff] %vm731_vm0, %v719_v22  ;;  %856 = vst.msk [vmem:[%s1578_s2 + $0x3e0] sm:$0xff] %vm731_vm0, %v715_v14 }
  0xfd   :  { %v730_v15 = vpop.permute.xlu1 %729  ;;  %v726_v23 = vpop.permute.xlu0 %725 }
  0xfe   :  { %859 = vst.msk [vmem:[%s1578_s2 + $0x3f8] sm:$0xff] %vm731_vm0, %v730_v15  ;;  %858 = vst.msk [vmem:[%s1578_s2 + $0x3f0] sm:$0xff] %vm731_vm0, %v726_v23 }

</bundles_post_ra>
